<compile_context>
chip_gen: v5e
topology: v5e:2x2
jax: 0.10.0
libtpu: 0.0.40
codegen_flags: <defaults>
</compile_context>

<pallas_src>
import functools

import jax
import jax.numpy as jnp
from jax.experimental import pallas as pl
from jax.experimental.pallas import tpu as pltpu

PAD_FEAT = 128    # lane-dense feature width (one 128-lane tile)
PAD_BATCH = 8     # f32 sublane multiple
CONST_LANE = 64   # padded lane reserved as the constant-1 "bias" lane
                  # (valid because every true din/dout <= 64 < CONST_LANE+1)


def _fused_mlp_kernel(x_ref, w_ref, o_ref, *, n_layers):
    """Fused sequential MLP with bias folded into a constant-1 lane.

    x_ref : (PAD_BATCH, PAD_FEAT)            f32 VMEM, lane CONST_LANE == 1.0
    w_ref : (n_layers, PAD_FEAT, PAD_FEAT)   bf16 VMEM weight stack
                                             (row CONST_LANE holds bias + 1.0 at
                                              [CONST_LANE, CONST_LANE] so the
                                              constant lane survives each layer)
    o_ref : (PAD_BATCH, PAD_FEAT)            f32 VMEM
    Hidden activations stay in vregs; only the final result is stored.
    """
    h = x_ref[...]
    for i in range(n_layers):                       # static unroll (3 layers)
        w = w_ref[i].astype(jnp.float32)            # bf16 -> f32 in-vreg (VPU)
        h = jnp.dot(h, w, preferred_element_type=jnp.float32)
        if i < n_layers - 1:                        # hidden layers: ReLU; last layer pure Linear
            h = jnp.maximum(h, 0.0)                 # ReLU(1) = 1 keeps the const lane alive
    o_ref[...] = h.astype(o_ref.dtype)


@functools.partial(jax.jit, static_argnames=("out_dim",))
def model_forward(x, w_stack, out_dim):
    """Equivalent of Model.forward: apply every module in sequence (fully fused)."""
    B, Din = x.shape
    n_layers = w_stack.shape[0]

    # Pad the activation once to the lane-dense (8, 128) slab; padded lanes are
    # zero except the constant-1 bias lane.  Zero-padded weight rows/cols keep the
    # padded lanes exactly zero layer-to-layer.
    x_p = jnp.zeros((PAD_BATCH, PAD_FEAT), jnp.float32)
    x_p = x_p.at[:B, :Din].set(x.astype(jnp.float32))
    x_p = x_p.at[:, CONST_LANE].set(1.0)

    vmem_spec = pl.BlockSpec(memory_space=pltpu.MemorySpace.VMEM)
    out_p = pl.pallas_call(
        functools.partial(_fused_mlp_kernel, n_layers=n_layers),
        out_shape=jax.ShapeDtypeStruct((PAD_BATCH, PAD_FEAT), jnp.float32),
        in_specs=[vmem_spec, vmem_spec],
        out_specs=vmem_spec,
    )(x_p, w_stack)

    # NOTE: padded rows 1..PAD_BATCH-1 / lanes >= out_dim of the slab carry
    # bias-propagated garbage by design; only this slice is meaningful.
    return out_p[:B, :out_dim]


def init_params(key, layer_dims):
    """Deterministic Linear params.

    Returns:
      ref_params : list of (w (din,dout) f32, b (dout,) f32) -- bf16-rounded, for the reference
      w_stack    : (n_layers, 128, 128) bf16 -- zero-padded weights with bias folded
                   into the constant-1 lane, for the kernel.
    """
    n_layers = len(layer_dims) - 1
    w_stack = jnp.zeros((n_layers, PAD_FEAT, PAD_FEAT), jnp.bfloat16)
    ref_params = []
    for i, (din, dout) in enumerate(zip(layer_dims[:-1], layer_dims[1:])):
        kw, kb, key = jax.random.split(key, 3)
        bound = 1.0 / (din ** 0.5)          # nn.Linear-style default init bound
        w = jax.random.uniform(kw, (din, dout), jnp.float32, -bound, bound)
        b = jax.random.uniform(kb, (dout,), jnp.float32, -bound, bound)

        # Round once to bf16 (what the kernel sees); reference uses the same values.
        w_bf = w.astype(jnp.bfloat16)
        b_bf = b.astype(jnp.bfloat16)
        ref_params.append((w_bf.astype(jnp.float32), b_bf.astype(jnp.float32)))

        # Pad once (not per forward call): zero rows/cols keep padded lanes 0;
        # row CONST_LANE carries the bias + a 1.0 to propagate the constant lane.
        w_stack = w_stack.at[i, :din, :dout].set(w_bf)
        w_stack = w_stack.at[i, CONST_LANE, :dout].set(b_bf)
        w_stack = w_stack.at[i, CONST_LANE, CONST_LANE].set(jnp.asarray(1.0, jnp.bfloat16))
    return ref_params, w_stack


if __name__ == "__main__":
    key = jax.random.PRNGKey(0)
    kx, kp = jax.random.split(key)

    # get_random_input(input_size) -> torch.rand(1, input_size)  => batch = 1
    batch = 1
    layer_dims = (32, 64, 64, 32)  # Linear(32,64)+ReLU, Linear(64,64)+ReLU, Linear(64,32)

    x = jax.random.uniform(kx, (batch, layer_dims[0]), jnp.float32)
    ref_params, w_stack = init_params(kp, layer_dims)

    out = model_forward(x, w_stack, out_dim=layer_dims[-1])
    out = jax.block_until_ready(out)

    # Pure-JAX reference of the sequential Model.forward (f32, HIGHEST precision,
    # same bf16-rounded weights as the kernel).
    ref = x
    for i, (w, b) in enumerate(ref_params):
        ref = jnp.dot(ref, w, precision=jax.lax.Precision.HIGHEST) + b
        if i < len(ref_params) - 1:
            ref = jnp.maximum(ref, 0.0)

    assert out.shape == (batch, layer_dims[-1])
    assert jnp.allclose(out, ref, atol=1e-4, rtol=1e-4), (
        float(jnp.max(jnp.abs(out - ref))))

    print("KERNEL_OK")
</pallas_src>

<mosaic_0001>
module attributes {stable_mosaic.version = 11 : i64} {
  func.func @_fused_mlp_kernel(%arg0: memref<8x128xf32, #tpu.memory_space<vmem>>, %arg1: memref<3x128x128xbf16, #tpu.memory_space<vmem>>, %arg2: memref<8x128xf32, #tpu.memory_space<vmem>>) attributes {dimension_semantics = [], scalar_prefetch = 0 : i64, scratch_operands = 0 : i64, tpu.core_type = #tpu.core_type<tc>} {
    %c0 = arith.constant 0 : index
    %c0_0 = arith.constant 0 : index
    %0 = vector.load %arg0[%c0, %c0_0] : memref<8x128xf32, #tpu.memory_space<vmem>>, vector<8x128xf32>
    %c0_1 = arith.constant 0 : index
    %c0_2 = arith.constant 0 : index
    %c0_3 = arith.constant 0 : index
    %1 = vector.load %arg1[%c0_1, %c0_2, %c0_3] : memref<3x128x128xbf16, #tpu.memory_space<vmem>>, vector<1x128x128xbf16>
    %2 = vector.shape_cast %1 : vector<1x128x128xbf16> to vector<128x128xbf16>
    %3 = arith.extf %2 : vector<128x128xbf16> to vector<128x128xf32>
    %cst = arith.constant dense<0.000000e+00> : vector<8x128xf32>
    %4 = tpu.matmul %0, %3, %cst {dimension_numbers = #tpu.dot_dimension_numbers<[1], [0], [0], [1], [0, 0, 1, 1], [], []>} : vector<8x128xf32>, vector<128x128xf32>, vector<8x128xf32> -> vector<8x128xf32>
    %cst_4 = arith.constant 0.000000e+00 : f32
    %5 = vector.broadcast %cst_4 : f32 to vector<8x128xf32>
    %6 = arith.maximumf %4, %5 : vector<8x128xf32>
    %c1 = arith.constant 1 : index
    %c0_5 = arith.constant 0 : index
    %c0_6 = arith.constant 0 : index
    %7 = vector.load %arg1[%c1, %c0_5, %c0_6] : memref<3x128x128xbf16, #tpu.memory_space<vmem>>, vector<1x128x128xbf16>
    %8 = vector.shape_cast %7 : vector<1x128x128xbf16> to vector<128x128xbf16>
    %9 = arith.extf %8 : vector<128x128xbf16> to vector<128x128xf32>
    %cst_7 = arith.constant dense<0.000000e+00> : vector<8x128xf32>
    %10 = tpu.matmul %6, %9, %cst_7 {dimension_numbers = #tpu.dot_dimension_numbers<[1], [0], [0], [1], [0, 0, 1, 1], [], []>} : vector<8x128xf32>, vector<128x128xf32>, vector<8x128xf32> -> vector<8x128xf32>
    %cst_8 = arith.constant 0.000000e+00 : f32
    %11 = vector.broadcast %cst_8 : f32 to vector<8x128xf32>
    %12 = arith.maximumf %10, %11 : vector<8x128xf32>
    %c2 = arith.constant 2 : index
    %c0_9 = arith.constant 0 : index
    %c0_10 = arith.constant 0 : index
    %13 = vector.load %arg1[%c2, %c0_9, %c0_10] : memref<3x128x128xbf16, #tpu.memory_space<vmem>>, vector<1x128x128xbf16>
    %14 = vector.shape_cast %13 : vector<1x128x128xbf16> to vector<128x128xbf16>
    %15 = arith.extf %14 : vector<128x128xbf16> to vector<128x128xf32>
    %cst_11 = arith.constant dense<0.000000e+00> : vector<8x128xf32>
    %16 = tpu.matmul %12, %15, %cst_11 {dimension_numbers = #tpu.dot_dimension_numbers<[1], [0], [0], [1], [0, 0, 1, 1], [], []>} : vector<8x128xf32>, vector<128x128xf32>, vector<8x128xf32> -> vector<8x128xf32>
    %c0_12 = arith.constant 0 : index
    %c0_13 = arith.constant 0 : index
    %17 = vector.load %arg2[%c0_12, %c0_13] : memref<8x128xf32, #tpu.memory_space<vmem>>, vector<8x128xf32>
    tpu.vector_store %arg2[%c0_12, %c0_13], %16 {strides = array<i32>} : memref<8x128xf32, #tpu.memory_space<vmem>>, vector<8x128xf32>,
    return
  }
}

</mosaic_0001>

<bundles_post_ra>
// kernel: model_forward.1
= control target key start
LH: loop header
LB: loop body
LE: loop exit
PB: predicated region body
PF: predicated region fallthrough
CT: control target
= control target key end

     0   :  { %7 = vsyncpa [#allocation3], 0  ;;  %s340_s12 = smov [#allocation2]   ;;  %s341_s14 = smov 64   ;;  %s367_s0 = inlined_call_operand.vmem [shape: f32[8,128], index: 0, kind: input, shape index: {}]   ;;  %s368_s1 = inlined_call_operand.hbm [shape: bf16[3,128,128], index: 1, kind: input, shape index: {}]   ;;  %s369_s2 = inlined_call_operand.vmem [shape: f32[8,128], index: 2, kind: output, shape index: {}]  }
   0x1   :  { %s14_s11 = sshll.u32 %s368_s1, 4  ;;  %s16_s13 = sshll.u32 %s340_s12, 4  ;;  %s15_s11 = int_to_ptr.hbm [resolvable:$true] %s14_s11  ;;  %s17_s13 = int_to_ptr.vmem [resolvable:$true] %s16_s13 }
   0x2   :  { %s342_s15 = smov 4  }
   0x3   :  { %22 = dma.hbm_to_vmem [thread:$0]  %s15_s11, 3072, %s17_s13, [#allocation3], %s341_s14, %s341_s14, %s342_s15  }
   0x4   :  { %338 = dma.done.wait [#allocation3], 3072  }
   0x5   :  { %339 = vsyncadd [#allocation3], 4294964224  ;;  %v296_v0 = vld [vmem:[#allocation2 + $0x38] sm:$0xff]   ;;  %v295_v1 = vld [vmem:[#allocation2 + $0x30] sm:$0xff]  }
   0x6   :  { %v225_v2 = vunpack.c.h.bf16 %v296_v0  ;;  %v224_v3 = vunpack.c.l.bf16 %v296_v0  ;;  %v221_v4 = vunpack.c.h.bf16 %v295_v1  ;;  %v303_v5 = vld [vmem:[#allocation2 + $0x78] sm:$0xff]   ;;  %v294_v6 = vld [vmem:[#allocation2 + $0x28] sm:$0xff]   ;;  %v302_v7 = vld [vmem:[#allocation2 + $0x70] sm:$0xff]   ;;  %v220_v8 = vunpack.c.l.bf16 %v295_v1 }
   0x7   :  { %v257_v9 = vunpack.c.h.bf16 %v303_v5  ;;  %v256_v10 = vunpack.c.l.bf16 %v303_v5  ;;  %v217_v11 = vunpack.c.h.bf16 %v294_v6  ;;  %v253_v12 = vunpack.c.h.bf16 %v302_v7  ;;  %v293_v13 = vld [vmem:[#allocation2 + $0x20] sm:$0xff]   ;;  %v301_v14 = vld [vmem:[#allocation2 + $0x68] sm:$0xff]   ;;  %v292_v19 = vld [vmem:[#allocation2 + $0x18] sm:$0xff]  }
   0x8   :  { %60 = vmatpush.msra.mxu0 %v225_v2  ;;  %v216_v15 = vunpack.c.l.bf16 %v294_v6  ;;  %v252_v16 = vunpack.c.l.bf16 %v302_v7  ;;  %v213_v17 = vunpack.c.h.bf16 %v293_v13  ;;  %v249_v18 = vunpack.c.h.bf16 %v301_v14  ;;  %v300_v20 = vld [vmem:[#allocation2 + $0x60] sm:$0xff]   ;;  %v291_v25 = vld [vmem:[#allocation2 + $0x10] sm:$0xff]   ;;  %v299_v26 = vld [vmem:[#allocation2 + $0x58] sm:$0xff]  }
   0x9   :  { %114 = vmatpush.msra.mxu1 %v257_v9  ;;  %v212_v21 = vunpack.c.l.bf16 %v293_v13  ;;  %v248_v22 = vunpack.c.l.bf16 %v301_v14  ;;  %v209_v23 = vunpack.c.h.bf16 %v292_v19  ;;  %v245_v24 = vunpack.c.h.bf16 %v300_v20  ;;  %v290_v31 = vld [vmem:[#allocation2 + $0x8] sm:$0xff]   ;;  %v298_v32 = vld [vmem:[#allocation2 + $0x50] sm:$0xff]   ;;  %v195_v37 = vld [vmem:[#allocation2] sm:$0xff]  }
   0xa   :  { %61 = vmatpush.msra.mxu0 %v224_v3  ;;  %v208_v27 = vunpack.c.l.bf16 %v292_v19  ;;  %v244_v28 = vunpack.c.l.bf16 %v300_v20  ;;  %v205_v29 = vunpack.c.h.bf16 %v291_v25  ;;  %v241_v30 = vunpack.c.h.bf16 %v299_v26  ;;  %v297_v38 = vld [vmem:[#allocation2 + $0x48] sm:$0xff]   ;;  %v27_v45 = vld [vmem:[%s367_s0] sm:$0xff]  ;;  %v310_v49 = vld [vmem:[#allocation2 + $0xb8] sm:$0xff]  }
   0xb   :  { %115 = vmatpush.msra.mxu1 %v256_v10  ;;  %v204_v33 = vunpack.c.l.bf16 %v291_v25  ;;  %v240_v34 = vunpack.c.l.bf16 %v299_v26  ;;  %v201_v35 = vunpack.c.h.bf16 %v290_v31  ;;  %v237_v36 = vunpack.c.h.bf16 %v298_v32  ;;  %v227_v46 = vld [vmem:[#allocation2 + $0x40] sm:$0xff]   ;;  %v309_v50 = vld [vmem:[#allocation2 + $0xb0] sm:$0xff]   ;;  %v308_v54 = vld [vmem:[#allocation2 + $0xa8] sm:$0xff]  }
   0xc   :  { %62 = vmatpush.msra.mxu0 %v221_v4  ;;  %v200_v39 = vunpack.c.l.bf16 %v290_v31  ;;  %v236_v40 = vunpack.c.l.bf16 %v298_v32  ;;  %v197_v41 = vunpack.c.h.bf16 %v195_v37  ;;  %v233_v42 = vunpack.c.h.bf16 %v297_v38  ;;  %v307_v57 = vld [vmem:[#allocation2 + $0xa0] sm:$0xff]   ;;  %v306_v60 = vld [vmem:[#allocation2 + $0x98] sm:$0xff]   ;;  %v305_v63 = vld [vmem:[#allocation2 + $0x90] sm:$0xff]  }
   0xd   :  { %116 = vmatpush.msra.mxu1 %v253_v12  ;;  %v196_v43 = vunpack.c.l.bf16 %v195_v37  ;;  %v232_v44 = vunpack.c.l.bf16 %v297_v38  ;;  %v229_v47 = vunpack.c.h.bf16 %v227_v46  ;;  %v228_v48 = vunpack.c.l.bf16 %v227_v46  ;;  %v304_v2 = vld [vmem:[#allocation2 + $0x88] sm:$0xff]  }
   0xe   :  { %63 = vmatpush.msra.mxu0 %v220_v8  ;;  %v289_v51 = vunpack.c.h.bf16 %v310_v49  ;;  %v288_v52 = vunpack.c.l.bf16 %v310_v49  ;;  %v285_v53 = vunpack.c.h.bf16 %v309_v50  ;;  %v284_v55 = vunpack.c.l.bf16 %v309_v50  ;;  %v259_v8 = vld [vmem:[#allocation2 + $0x80] sm:$0xff]  }
   0xf   :  { %117 = vmatpush.msra.mxu1 %v252_v16  ;;  %v281_v56 = vunpack.c.h.bf16 %v308_v54  ;;  %v280_v58 = vunpack.c.l.bf16 %v308_v54  ;;  %v277_v59 = vunpack.c.h.bf16 %v307_v57  ;;  %v276_v61 = vunpack.c.l.bf16 %v307_v57 }
  0x10   :  { %64 = vmatpush.msra.mxu0 %v217_v11  ;;  %168 = vmatpush.msra.mxu2 %v289_v51  ;;  %v273_v62 = vunpack.c.h.bf16 %v306_v60  ;;  %v272_v0 = vunpack.c.l.bf16 %v306_v60  ;;  %v269_v1 = vunpack.c.h.bf16 %v305_v63  ;;  %v268_v3 = vunpack.c.l.bf16 %v305_v63 }
  0x11   :  { %118 = vmatpush.msra.mxu1 %v249_v18  ;;  %v265_v4 = vunpack.c.h.bf16 %v304_v2  ;;  %v264_v5 = vunpack.c.l.bf16 %v304_v2  ;;  %v261_v9 = vunpack.c.h.bf16 %v259_v8  ;;  %v260_v10 = vunpack.c.l.bf16 %v259_v8 }
  0x12   :  { %65 = vmatpush.msra.mxu0 %v216_v15  ;;  %169 = vmatpush.msra.mxu2 %v288_v52 }
  0x13   :  { %119 = vmatpush.msra.mxu1 %v248_v22 }
  0x14   :  { %66 = vmatpush.msra.mxu0 %v213_v17  ;;  %170 = vmatpush.msra.mxu2 %v285_v53 }
  0x15   :  { %120 = vmatpush.msra.mxu1 %v245_v24 }
  0x16   :  { %67 = vmatpush.msra.mxu0 %v212_v21  ;;  %171 = vmatpush.msra.mxu2 %v284_v55 }
  0x17   :  { %121 = vmatpush.msra.mxu1 %v244_v28 }
  0x18   :  { %68 = vmatpush.msra.mxu0 %v209_v23  ;;  %172 = vmatpush.msra.mxu2 %v281_v56 }
  0x19   :  { %122 = vmatpush.msra.mxu1 %v241_v30 }
  0x1a   :  { %69 = vmatpush.msra.mxu0 %v208_v27  ;;  %173 = vmatpush.msra.mxu2 %v280_v58 }
  0x1b   :  { %123 = vmatpush.msra.mxu1 %v240_v34 }
  0x1c   :  { %70 = vmatpush.msra.mxu0 %v205_v29  ;;  %174 = vmatpush.msra.mxu2 %v277_v59 }
  0x1d   :  { %124 = vmatpush.msra.mxu1 %v237_v36 }
  0x1e   :  { %71 = vmatpush.msra.mxu0 %v204_v33  ;;  %175 = vmatpush.msra.mxu2 %v276_v61 }
  0x1f   :  { %125 = vmatpush.msra.mxu1 %v236_v40 }
  0x20   :  { %72 = vmatpush.msra.mxu0 %v201_v35  ;;  %176 = vmatpush.msra.mxu2 %v273_v62 }
  0x21   :  { %126 = vmatpush.msra.mxu1 %v233_v42 }
  0x22   :  { %73 = vmatpush.msra.mxu0 %v200_v39  ;;  %177 = vmatpush.msra.mxu2 %v272_v0 }
  0x23   :  { %127 = vmatpush.msra.mxu1 %v232_v44 }
  0x24   :  { %74 = vmatpush.msra.mxu0 %v197_v41  ;;  %178 = vmatpush.msra.mxu2 %v269_v1 }
  0x25   :  { %128 = vmatpush.msra.mxu1 %v229_v47 }
  0x26   :  { %75 = vmatpush.msra.mxu0 %v196_v43  ;;  %179 = vmatpush.msra.mxu2 %v268_v3 }
  0x27   :  { %76 = vmatmul.f32.vlgmr.msra.gmra.mxu0 %v27_v45  ;;  %129 = vmatpush.msra.mxu1 %v228_v48 }
  0x28   :  { %180 = vmatpush.msra.mxu2 %v265_v4 }
  0x2a   :  { %181 = vmatpush.msra.mxu2 %v264_v5 }
  0x2c   :  { %182 = vmatpush.msra.mxu2 %v261_v9 }
  0x2e   :  { %183 = vmatpush.msra.mxu2 %v260_v10 }
  0xa4   :  { %v77_v6 = vpop.f32.mrf.mxu0 }
  0xa5   :  { %v80_v7 = vmax.f32 %v77_v6, 0.0 }
  0xa7   :  { %130 = vmatmul.f32.vlgmr.msra.gmra.mxu1 %v80_v7 }
 0x124   :  { %v131_v11 = vpop.f32.mrf.mxu1 }
 0x125   :  { %v134_v12 = vmax.f32 %v131_v11, 0.0 }
 0x127   :  { %184 = vmatmul.f32.vlgmr.msra.gmra.mxu2 %v134_v12 }
 0x1aa   :  { %v185_v13 = vpop.f32.mrf.mxu2 }
 0x1ab   :  { %188 = vst [vmem:[%s369_s2] sm:$0xff] %v185_v13 }
 0x1ac   :  { %193 = vsyncpa [#allocation3], 1 }

</bundles_post_ra>
